<compile_context>
chip_gen: v6e
topology: v6e:2x2x1
jax: 0.10.0
libtpu: 0.0.40
codegen_flags: <defaults>
</compile_context>

<pallas_src>
import functools

import jax
import jax.numpy as jnp
from jax import lax
from jax.experimental import pallas as pl
from jax.experimental.pallas import tpu as pltpu


def _conv_block_kernel(x_ref, w1_ref, b1_ref, w2_ref, b2_ref, m_ref, o_ref,
                       *, H, W, slope, eps):
    # x_ref:  (1, Cin, H*W)      one image, channels on sublanes, flat spatial on lanes
    # w1_ref: (Cout, 9*Cin)      scale already folded in
    # w2_ref: (Cout, 9*Cout)
    # b*_ref: (Cout, 1)
    # m_ref:  (9, H*W)           {0,1} border-validity mask per 3x3 tap
    # o_ref:  (1, Cout, H*W)
    n = H * W
    x = x_ref[0].astype(jnp.float32)        # (Cin, n)
    masks = m_ref[...]                      # (9, n) float32

    taps = [(oy, ox) for oy in (-1, 0, 1) for ox in (-1, 0, 1)]

    def shift_lanes(a, s):
        # t[:, p] = a[:, p + s] for 0 <= p + s < n, else 0.  Static slices only.
        if s == 0:
            return a
        c = a.shape[0]
        if s > 0:
            return jnp.concatenate(
                [a[:, s:], jnp.zeros((c, s), a.dtype)], axis=1)
        return jnp.concatenate(
            [jnp.zeros((c, -s), a.dtype), a[:, :n + s]], axis=1)

    def im2col(a):
        # a: (C, n) -> (9*C, n); tap order (dy major, dx minor) matches the
        # wrapper's weight reshape (3,3,C,Cout) -> (9*C, Cout).
        pieces = []
        for t, (oy, ox) in enumerate(taps):
            s = oy * W + ox
            pieces.append(shift_lanes(a, s) * masks[t:t + 1, :])
        return jnp.concatenate(pieces, axis=0)

    def lrelu(a):
        return jnp.maximum(a, slope * a)

    def pixel_norm(a):
        # channel axis == sublane axis 0 (== torch dim=1 in NCHW)
        ms = jnp.mean(a * a, axis=0, keepdims=True)      # (1, n)
        return a * lax.rsqrt(ms + eps)

    # ---- conv1: one MXU matmul, K = 9*Cin ----
    y = jnp.dot(w1_ref[...], im2col(x), preferred_element_type=jnp.float32)
    y = pixel_norm(lrelu(y + b1_ref[...]))               # (Cout, n)

    # ---- conv2: one MXU matmul, K = 9*Cout ----
    z = jnp.dot(w2_ref[...], im2col(y), preferred_element_type=jnp.float32)
    z = pixel_norm(lrelu(z + b2_ref[...]))               # (Cout, n)

    o_ref[0] = z.astype(o_ref.dtype)                     # full 256-lane stores


def conv_block(x_nchw, w1, b1, w2, b2, *, use_pixel_norm=True, gain=2.0):
    """Pallas ConvBlock.  x_nchw: (N, Cin, H, W), w*: HWIO.  Returns (N, Cout, H, W)."""
    assert use_pixel_norm, "kernel implements the default use_pixel_norm=True path"
    N, Cin, H, W = x_nchw.shape
    Cout = w1.shape[-1]
    assert w1.shape == (3, 3, Cin, Cout) and w2.shape == (3, 3, Cout, Cout)
    HW = H * W

    scale1 = (gain / (Cin * 9)) ** 0.5
    scale2 = (gain / (Cout * 9)) ** 0.5

    # Fold the weight-scaled-conv scale into the (tiny) weights and reshape
    # HWIO (3,3,C,Cout) -> (Cout, 9*C) for the single im2col matmul.
    w1_mat = (w1.astype(jnp.float32) * scale1).reshape(9 * Cin, Cout).T
    w2_mat = (w2.astype(jnp.float32) * scale2).reshape(9 * Cout, Cout).T
    b1_col = b1.reshape(Cout, 1).astype(jnp.float32)
    b2_col = b2.reshape(Cout, 1).astype(jnp.float32)

    # NCHW -> (N, C, H*W): a free reshape (no transpose, no jnp.pad HBM copies).
    x_flat = x_nchw.reshape(N, Cin, HW).astype(jnp.float32)

    # Precompute the 9 border-validity masks (one per 3x3 tap).
    rows = jnp.arange(H).reshape(H, 1)
    cols = jnp.arange(W).reshape(1, W)
    mask_list = []
    for oy in (-1, 0, 1):
        for ox in (-1, 0, 1):
            m = ((rows + oy >= 0) & (rows + oy < H) &
                 (cols + ox >= 0) & (cols + ox < W))
            mask_list.append(m.reshape(HW))
    masks = jnp.stack(mask_list, axis=0).astype(jnp.float32)   # (9, HW)

    kernel = functools.partial(_conv_block_kernel, H=H, W=W, slope=0.2, eps=1e-8)

    out_flat = pl.pallas_call(
        kernel,
        out_shape=jax.ShapeDtypeStruct((N, Cout, HW), jnp.float32),
        grid_spec=pltpu.PrefetchScalarGridSpec(
            num_scalar_prefetch=0,
            grid=(N,),
            in_specs=[
                pl.BlockSpec((1, Cin, HW), lambda n: (n, 0, 0)),
                pl.BlockSpec((Cout, 9 * Cin), lambda n: (0, 0)),
                pl.BlockSpec((Cout, 1), lambda n: (0, 0)),
                pl.BlockSpec((Cout, 9 * Cout), lambda n: (0, 0)),
                pl.BlockSpec((Cout, 1), lambda n: (0, 0)),
                pl.BlockSpec((9, HW), lambda n: (0, 0)),
            ],
            out_specs=pl.BlockSpec((1, Cout, HW), lambda n: (n, 0, 0)),
        ),
        compiler_params=pltpu.CompilerParams(
            dimension_semantics=("parallel",)),
    )(x_flat, w1_mat, b1_col, w2_mat, b2_col, masks)

    # (N, Cout, H*W) -> NCHW, free reshape; already matches torch layout.
    return out_flat.reshape(N, Cout, H, W)


def _ref_conv_block(x_nchw, w1, b1, w2, b2, *, gain=2.0):
    """Pure-JAX reference mirroring the PyTorch ConvBlock."""
    Cin, Cout = w1.shape[2], w1.shape[3]
    scale1 = (gain / (Cin * 9)) ** 0.5
    scale2 = (gain / (Cout * 9)) ** 0.5
    x = jnp.transpose(x_nchw, (0, 2, 3, 1)).astype(jnp.float32)

    def wsconv(x, w, b, scale):
        y = lax.conv_general_dilated(
            x * scale, w, window_strides=(1, 1), padding="SAME",
            dimension_numbers=("NHWC", "HWIO", "NHWC"))
        return y + b.reshape(1, 1, 1, -1)

    def pixel_norm(x):
        return x / jnp.sqrt(jnp.mean(x * x, axis=-1, keepdims=True) + 1e-8)

    def lrelu(x):
        return jnp.where(x > 0, x, 0.2 * x)

    x = pixel_norm(lrelu(wsconv(x, w1, b1, scale1)))
    x = pixel_norm(lrelu(wsconv(x, w2, b2, scale2)))
    return jnp.transpose(x, (0, 3, 1, 2))


if __name__ == "__main__":
    N, Cin, Cout, H, W = 2, 4, 8, 16, 16

    key = jax.random.PRNGKey(0)
    kx, kw1, kw2 = jax.random.split(key, 3)

    # Deterministic synthetic params: weights ~ N(0,1) (matches nn.init.normal_),
    # biases zero (matches nn.init.zeros_).
    x = jax.random.normal(kx, (N, Cin, H, W), jnp.float32)
    w1 = jax.random.normal(kw1, (3, 3, Cin, Cout), jnp.float32)   # HWIO
    w2 = jax.random.normal(kw2, (3, 3, Cout, Cout), jnp.float32)  # HWIO
    b1 = jnp.zeros((Cout,), jnp.float32)
    b2 = jnp.zeros((Cout,), jnp.float32)

    out = conv_block(x, w1, b1, w2, b2)
    out = jax.block_until_ready(out)

    ref = _ref_conv_block(x, w1, b1, w2, b2)
    assert out.shape == (N, Cout, H, W)
    assert jnp.allclose(out, ref, atol=1e-4, rtol=1e-4), "mismatch vs reference"

    print("KERNEL_OK")
</pallas_src>

<mosaic_0001>
module attributes {stable_mosaic.version = 11 : i64} {
  func.func @_conv_block_kernel(%arg0: i32, %arg1: memref<1x4x256xf32, #tpu.memory_space<vmem>>, %arg2: memref<8x36xf32, #tpu.memory_space<vmem>>, %arg3: memref<8x1xf32, #tpu.memory_space<vmem>>, %arg4: memref<8x72xf32, #tpu.memory_space<vmem>>, %arg5: memref<8x1xf32, #tpu.memory_space<vmem>>, %arg6: memref<9x256xf32, #tpu.memory_space<vmem>>, %arg7: memref<1x8x256xf32, #tpu.memory_space<vmem>>) attributes {dimension_semantics = [#tpu.dimension_semantics<parallel>], iteration_bounds = array<i64: 2>, scalar_prefetch = 0 : i64, scratch_operands = 0 : i64, tpu.core_type = #tpu.core_type<tc>, window_params = [{transform_indices = @transform_0, window_bounds = array<i64: 1, 4, 256>}, {pipeline_mode = #tpu.pipeline_mode<synchronous>, transform_indices = @transform_1, window_bounds = array<i64: 8, 36>}, {pipeline_mode = #tpu.pipeline_mode<synchronous>, transform_indices = @transform_2, window_bounds = array<i64: 8, 1>}, {pipeline_mode = #tpu.pipeline_mode<synchronous>, transform_indices = @transform_3, window_bounds = array<i64: 8, 72>}, {pipeline_mode = #tpu.pipeline_mode<synchronous>, transform_indices = @transform_4, window_bounds = array<i64: 8, 1>}, {pipeline_mode = #tpu.pipeline_mode<synchronous>, transform_indices = @transform_5, window_bounds = array<i64: 9, 256>}, {transform_indices = @transform_6, window_bounds = array<i64: 1, 8, 256>}]} {
    %c0 = arith.constant 0 : index
    %c0_0 = arith.constant 0 : index
    %c0_1 = arith.constant 0 : index
    %0 = vector.load %arg1[%c0, %c0_0, %c0_1] : memref<1x4x256xf32, #tpu.memory_space<vmem>>, vector<1x4x256xf32>
    %1 = vector.shape_cast %0 : vector<1x4x256xf32> to vector<4x256xf32>
    %c0_2 = arith.constant 0 : index
    %c0_3 = arith.constant 0 : index
    %2 = vector.load %arg6[%c0_2, %c0_3] : memref<9x256xf32, #tpu.memory_space<vmem>>, vector<9x256xf32>
    %c0_4 = arith.constant 0 : index
    %c0_5 = arith.constant 0 : index
    %3 = vector.load %arg2[%c0_4, %c0_5] : memref<8x36xf32, #tpu.memory_space<vmem>>, vector<8x36xf32>
    %cst = arith.constant 0.000000e+00 : f32
    %4 = vector.broadcast %cst : f32 to vector<4x17xf32>
    %5 = vector.extract_strided_slice %1 {offsets = [0, 0], sizes = [4, 239], strides = [1, 1]} : vector<4x256xf32> to vector<4x239xf32>
    %6 = tpu.concatenate %4, %5 in 1 : vector<4x17xf32>, vector<4x239xf32> -> vector<4x256xf32>
    %7 = vector.extract_strided_slice %2 {offsets = [0, 0], sizes = [1, 256], strides = [1, 1]} : vector<9x256xf32> to vector<1x256xf32>
    %8 = vector.broadcast %7 : vector<1x256xf32> to vector<4x256xf32>
    %9 = arith.mulf %6, %8 : vector<4x256xf32>
    %cst_6 = arith.constant 0.000000e+00 : f32
    %10 = vector.broadcast %cst_6 : f32 to vector<4x16xf32>
    %11 = vector.extract_strided_slice %1 {offsets = [0, 0], sizes = [4, 240], strides = [1, 1]} : vector<4x256xf32> to vector<4x240xf32>
    %12 = tpu.concatenate %10, %11 in 1 : vector<4x16xf32>, vector<4x240xf32> -> vector<4x256xf32>
    %13 = vector.extract_strided_slice %2 {offsets = [1, 0], sizes = [1, 256], strides = [1, 1]} : vector<9x256xf32> to vector<1x256xf32>
    %14 = vector.broadcast %13 : vector<1x256xf32> to vector<4x256xf32>
    %15 = arith.mulf %12, %14 : vector<4x256xf32>
    %cst_7 = arith.constant 0.000000e+00 : f32
    %16 = vector.broadcast %cst_7 : f32 to vector<4x15xf32>
    %17 = vector.extract_strided_slice %1 {offsets = [0, 0], sizes = [4, 241], strides = [1, 1]} : vector<4x256xf32> to vector<4x241xf32>
    %18 = tpu.concatenate %16, %17 in 1 : vector<4x15xf32>, vector<4x241xf32> -> vector<4x256xf32>
    %19 = vector.extract_strided_slice %2 {offsets = [2, 0], sizes = [1, 256], strides = [1, 1]} : vector<9x256xf32> to vector<1x256xf32>
    %20 = vector.broadcast %19 : vector<1x256xf32> to vector<4x256xf32>
    %21 = arith.mulf %18, %20 : vector<4x256xf32>
    %cst_8 = arith.constant 0.000000e+00 : f32
    %22 = vector.broadcast %cst_8 : f32 to vector<4x1xf32>
    %23 = vector.extract_strided_slice %1 {offsets = [0, 0], sizes = [4, 255], strides = [1, 1]} : vector<4x256xf32> to vector<4x255xf32>
    %24 = tpu.concatenate %22, %23 in 1 : vector<4x1xf32>, vector<4x255xf32> -> vector<4x256xf32>
    %25 = vector.extract_strided_slice %2 {offsets = [3, 0], sizes = [1, 256], strides = [1, 1]} : vector<9x256xf32> to vector<1x256xf32>
    %26 = vector.broadcast %25 : vector<1x256xf32> to vector<4x256xf32>
    %27 = arith.mulf %24, %26 : vector<4x256xf32>
    %28 = vector.extract_strided_slice %2 {offsets = [4, 0], sizes = [1, 256], strides = [1, 1]} : vector<9x256xf32> to vector<1x256xf32>
    %29 = vector.broadcast %28 : vector<1x256xf32> to vector<4x256xf32>
    %30 = arith.mulf %1, %29 : vector<4x256xf32>
    %31 = vector.extract_strided_slice %1 {offsets = [0, 1], sizes = [4, 255], strides = [1, 1]} : vector<4x256xf32> to vector<4x255xf32>
    %cst_9 = arith.constant 0.000000e+00 : f32
    %32 = vector.broadcast %cst_9 : f32 to vector<4x1xf32>
    %33 = tpu.concatenate %31, %32 in 1 : vector<4x255xf32>, vector<4x1xf32> -> vector<4x256xf32>
    %34 = vector.extract_strided_slice %2 {offsets = [5, 0], sizes = [1, 256], strides = [1, 1]} : vector<9x256xf32> to vector<1x256xf32>
    %35 = vector.broadcast %34 : vector<1x256xf32> to vector<4x256xf32>
    %36 = arith.mulf %33, %35 : vector<4x256xf32>
    %37 = vector.extract_strided_slice %1 {offsets = [0, 15], sizes = [4, 241], strides = [1, 1]} : vector<4x256xf32> to vector<4x241xf32>
    %cst_10 = arith.constant 0.000000e+00 : f32
    %38 = vector.broadcast %cst_10 : f32 to vector<4x15xf32>
    %39 = tpu.concatenate %37, %38 in 1 : vector<4x241xf32>, vector<4x15xf32> -> vector<4x256xf32>
    %40 = vector.extract_strided_slice %2 {offsets = [6, 0], sizes = [1, 256], strides = [1, 1]} : vector<9x256xf32> to vector<1x256xf32>
    %41 = vector.broadcast %40 : vector<1x256xf32> to vector<4x256xf32>
    %42 = arith.mulf %39, %41 : vector<4x256xf32>
    %43 = vector.extract_strided_slice %1 {offsets = [0, 16], sizes = [4, 240], strides = [1, 1]} : vector<4x256xf32> to vector<4x240xf32>
    %cst_11 = arith.constant 0.000000e+00 : f32
    %44 = vector.broadcast %cst_11 : f32 to vector<4x16xf32>
    %45 = tpu.concatenate %43, %44 in 1 : vector<4x240xf32>, vector<4x16xf32> -> vector<4x256xf32>
    %46 = vector.extract_strided_slice %2 {offsets = [7, 0], sizes = [1, 256], strides = [1, 1]} : vector<9x256xf32> to vector<1x256xf32>
    %47 = vector.broadcast %46 : vector<1x256xf32> to vector<4x256xf32>
    %48 = arith.mulf %45, %47 : vector<4x256xf32>
    %49 = vector.extract_strided_slice %1 {offsets = [0, 17], sizes = [4, 239], strides = [1, 1]} : vector<4x256xf32> to vector<4x239xf32>
    %cst_12 = arith.constant 0.000000e+00 : f32
    %50 = vector.broadcast %cst_12 : f32 to vector<4x17xf32>
    %51 = tpu.concatenate %49, %50 in 1 : vector<4x239xf32>, vector<4x17xf32> -> vector<4x256xf32>
    %52 = vector.extract_strided_slice %2 {offsets = [8, 0], sizes = [1, 256], strides = [1, 1]} : vector<9x256xf32> to vector<1x256xf32>
    %53 = vector.broadcast %52 : vector<1x256xf32> to vector<4x256xf32>
    %54 = arith.mulf %51, %53 : vector<4x256xf32>
    %55 = tpu.concatenate %9, %15, %21, %27, %30, %36, %42, %48, %54 in 0 : vector<4x256xf32>, vector<4x256xf32>, vector<4x256xf32>, vector<4x256xf32>, vector<4x256xf32>, vector<4x256xf32>, vector<4x256xf32>, vector<4x256xf32>, vector<4x256xf32> -> vector<36x256xf32>
    %cst_13 = arith.constant dense<0.000000e+00> : vector<8x256xf32>
    %56 = tpu.matmul %3, %55, %cst_13 {dimension_numbers = #tpu.dot_dimension_numbers<[1], [0], [0], [1], [0, 0, 1, 1], [], []>} : vector<8x36xf32>, vector<36x256xf32>, vector<8x256xf32> -> vector<8x256xf32>
    %c0_14 = arith.constant 0 : index
    %c0_15 = arith.constant 0 : index
    %57 = vector.load %arg3[%c0_14, %c0_15] : memref<8x1xf32, #tpu.memory_space<vmem>>, vector<8x1xf32>
    %58 = vector.broadcast %57 : vector<8x1xf32> to vector<8x256xf32>
    %59 = arith.addf %56, %58 : vector<8x256xf32>
    %cst_16 = arith.constant 2.000000e-01 : f32
    %60 = vector.broadcast %cst_16 : f32 to vector<8x256xf32>
    %61 = arith.mulf %60, %59 : vector<8x256xf32>
    %62 = arith.maximumf %59, %61 : vector<8x256xf32>
    %63 = arith.mulf %62, %62 : vector<8x256xf32>
    %cst_17 = arith.constant dense<0.000000e+00> : vector<256xf32>
    %64 = vector.multi_reduction <add>, %63, %cst_17 [0] : vector<8x256xf32> to vector<256xf32>
    %65 = vector.shape_cast %64 : vector<256xf32> to vector<1x256xf32>
    %cst_18 = arith.constant 8.000000e+00 : f32
    %66 = vector.broadcast %cst_18 : f32 to vector<1x256xf32>
    %67 = arith.divf %65, %66 : vector<1x256xf32>
    %cst_19 = arith.constant 9.99999993E-9 : f32
    %68 = vector.broadcast %cst_19 : f32 to vector<1x256xf32>
    %69 = arith.addf %67, %68 : vector<1x256xf32>
    %70 = math.rsqrt %69 : vector<1x256xf32>
    %71 = vector.broadcast %70 : vector<1x256xf32> to vector<8x256xf32>
    %72 = arith.mulf %62, %71 : vector<8x256xf32>
    %c0_20 = arith.constant 0 : index
    %c0_21 = arith.constant 0 : index
    %73 = vector.load %arg4[%c0_20, %c0_21] : memref<8x72xf32, #tpu.memory_space<vmem>>, vector<8x72xf32>
    %cst_22 = arith.constant 0.000000e+00 : f32
    %74 = vector.broadcast %cst_22 : f32 to vector<8x17xf32>
    %75 = vector.extract_strided_slice %72 {offsets = [0, 0], sizes = [8, 239], strides = [1, 1]} : vector<8x256xf32> to vector<8x239xf32>
    %76 = tpu.concatenate %74, %75 in 1 : vector<8x17xf32>, vector<8x239xf32> -> vector<8x256xf32>
    %77 = vector.extract_strided_slice %2 {offsets = [0, 0], sizes = [1, 256], strides = [1, 1]} : vector<9x256xf32> to vector<1x256xf32>
    %78 = vector.broadcast %77 : vector<1x256xf32> to vector<8x256xf32>
    %79 = arith.mulf %76, %78 : vector<8x256xf32>
    %cst_23 = arith.constant 0.000000e+00 : f32
    %80 = vector.broadcast %cst_23 : f32 to vector<8x16xf32>
    %81 = vector.extract_strided_slice %72 {offsets = [0, 0], sizes = [8, 240], strides = [1, 1]} : vector<8x256xf32> to vector<8x240xf32>
    %82 = tpu.concatenate %80, %81 in 1 : vector<8x16xf32>, vector<8x240xf32> -> vector<8x256xf32>
    %83 = vector.extract_strided_slice %2 {offsets = [1, 0], sizes = [1, 256], strides = [1, 1]} : vector<9x256xf32> to vector<1x256xf32>
    %84 = vector.broadcast %83 : vector<1x256xf32> to vector<8x256xf32>
    %85 = arith.mulf %82, %84 : vector<8x256xf32>
    %cst_24 = arith.constant 0.000000e+00 : f32
    %86 = vector.broadcast %cst_24 : f32 to vector<8x15xf32>
    %87 = vector.extract_strided_slice %72 {offsets = [0, 0], sizes = [8, 241], strides = [1, 1]} : vector<8x256xf32> to vector<8x241xf32>
    %88 = tpu.concatenate %86, %87 in 1 : vector<8x15xf32>, vector<8x241xf32> -> vector<8x256xf32>
    %89 = vector.extract_strided_slice %2 {offsets = [2, 0], sizes = [1, 256], strides = [1, 1]} : vector<9x256xf32> to vector<1x256xf32>
    %90 = vector.broadcast %89 : vector<1x256xf32> to vector<8x256xf32>
    %91 = arith.mulf %88, %90 : vector<8x256xf32>
    %cst_25 = arith.constant 0.000000e+00 : f32
    %92 = vector.broadcast %cst_25 : f32 to vector<8x1xf32>
    %93 = vector.extract_strided_slice %72 {offsets = [0, 0], sizes = [8, 255], strides = [1, 1]} : vector<8x256xf32> to vector<8x255xf32>
    %94 = tpu.concatenate %92, %93 in 1 : vector<8x1xf32>, vector<8x255xf32> -> vector<8x256xf32>
    %95 = vector.extract_strided_slice %2 {offsets = [3, 0], sizes = [1, 256], strides = [1, 1]} : vector<9x256xf32> to vector<1x256xf32>
    %96 = vector.broadcast %95 : vector<1x256xf32> to vector<8x256xf32>
    %97 = arith.mulf %94, %96 : vector<8x256xf32>
    %98 = vector.extract_strided_slice %2 {offsets = [4, 0], sizes = [1, 256], strides = [1, 1]} : vector<9x256xf32> to vector<1x256xf32>
    %99 = vector.broadcast %98 : vector<1x256xf32> to vector<8x256xf32>
    %100 = arith.mulf %72, %99 : vector<8x256xf32>
    %101 = vector.extract_strided_slice %72 {offsets = [0, 1], sizes = [8, 255], strides = [1, 1]} : vector<8x256xf32> to vector<8x255xf32>
    %cst_26 = arith.constant 0.000000e+00 : f32
    %102 = vector.broadcast %cst_26 : f32 to vector<8x1xf32>
    %103 = tpu.concatenate %101, %102 in 1 : vector<8x255xf32>, vector<8x1xf32> -> vector<8x256xf32>
    %104 = vector.extract_strided_slice %2 {offsets = [5, 0], sizes = [1, 256], strides = [1, 1]} : vector<9x256xf32> to vector<1x256xf32>
    %105 = vector.broadcast %104 : vector<1x256xf32> to vector<8x256xf32>
    %106 = arith.mulf %103, %105 : vector<8x256xf32>
    %107 = vector.extract_strided_slice %72 {offsets = [0, 15], sizes = [8, 241], strides = [1, 1]} : vector<8x256xf32> to vector<8x241xf32>
    %cst_27 = arith.constant 0.000000e+00 : f32
    %108 = vector.broadcast %cst_27 : f32 to vector<8x15xf32>
    %109 = tpu.concatenate %107, %108 in 1 : vector<8x241xf32>, vector<8x15xf32> -> vector<8x256xf32>
    %110 = vector.extract_strided_slice %2 {offsets = [6, 0], sizes = [1, 256], strides = [1, 1]} : vector<9x256xf32> to vector<1x256xf32>
    %111 = vector.broadcast %110 : vector<1x256xf32> to vector<8x256xf32>
    %112 = arith.mulf %109, %111 : vector<8x256xf32>
    %113 = vector.extract_strided_slice %72 {offsets = [0, 16], sizes = [8, 240], strides = [1, 1]} : vector<8x256xf32> to vector<8x240xf32>
    %cst_28 = arith.constant 0.000000e+00 : f32
    %114 = vector.broadcast %cst_28 : f32 to vector<8x16xf32>
    %115 = tpu.concatenate %113, %114 in 1 : vector<8x240xf32>, vector<8x16xf32> -> vector<8x256xf32>
    %116 = vector.extract_strided_slice %2 {offsets = [7, 0], sizes = [1, 256], strides = [1, 1]} : vector<9x256xf32> to vector<1x256xf32>
    %117 = vector.broadcast %116 : vector<1x256xf32> to vector<8x256xf32>
    %118 = arith.mulf %115, %117 : vector<8x256xf32>
    %119 = vector.extract_strided_slice %72 {offsets = [0, 17], sizes = [8, 239], strides = [1, 1]} : vector<8x256xf32> to vector<8x239xf32>
    %cst_29 = arith.constant 0.000000e+00 : f32
    %120 = vector.broadcast %cst_29 : f32 to vector<8x17xf32>
    %121 = tpu.concatenate %119, %120 in 1 : vector<8x239xf32>, vector<8x17xf32> -> vector<8x256xf32>
    %122 = vector.extract_strided_slice %2 {offsets = [8, 0], sizes = [1, 256], strides = [1, 1]} : vector<9x256xf32> to vector<1x256xf32>
    %123 = vector.broadcast %122 : vector<1x256xf32> to vector<8x256xf32>
    %124 = arith.mulf %121, %123 : vector<8x256xf32>
    %125 = tpu.concatenate %79, %85, %91, %97, %100, %106, %112, %118, %124 in 0 : vector<8x256xf32>, vector<8x256xf32>, vector<8x256xf32>, vector<8x256xf32>, vector<8x256xf32>, vector<8x256xf32>, vector<8x256xf32>, vector<8x256xf32>, vector<8x256xf32> -> vector<72x256xf32>
    %cst_30 = arith.constant dense<0.000000e+00> : vector<8x256xf32>
    %126 = tpu.matmul %73, %125, %cst_30 {dimension_numbers = #tpu.dot_dimension_numbers<[1], [0], [0], [1], [0, 0, 1, 1], [], []>} : vector<8x72xf32>, vector<72x256xf32>, vector<8x256xf32> -> vector<8x256xf32>
    %c0_31 = arith.constant 0 : index
    %c0_32 = arith.constant 0 : index
    %127 = vector.load %arg5[%c0_31, %c0_32] : memref<8x1xf32, #tpu.memory_space<vmem>>, vector<8x1xf32>
    %128 = vector.broadcast %127 : vector<8x1xf32> to vector<8x256xf32>
    %129 = arith.addf %126, %128 : vector<8x256xf32>
    %cst_33 = arith.constant 2.000000e-01 : f32
    %130 = vector.broadcast %cst_33 : f32 to vector<8x256xf32>
    %131 = arith.mulf %130, %129 : vector<8x256xf32>
    %132 = arith.maximumf %129, %131 : vector<8x256xf32>
    %133 = arith.mulf %132, %132 : vector<8x256xf32>
    %cst_34 = arith.constant dense<0.000000e+00> : vector<256xf32>
    %134 = vector.multi_reduction <add>, %133, %cst_34 [0] : vector<8x256xf32> to vector<256xf32>
    %135 = vector.shape_cast %134 : vector<256xf32> to vector<1x256xf32>
    %cst_35 = arith.constant 8.000000e+00 : f32
    %136 = vector.broadcast %cst_35 : f32 to vector<1x256xf32>
    %137 = arith.divf %135, %136 : vector<1x256xf32>
    %cst_36 = arith.constant 9.99999993E-9 : f32
    %138 = vector.broadcast %cst_36 : f32 to vector<1x256xf32>
    %139 = arith.addf %137, %138 : vector<1x256xf32>
    %140 = math.rsqrt %139 : vector<1x256xf32>
    %141 = vector.broadcast %140 : vector<1x256xf32> to vector<8x256xf32>
    %142 = arith.mulf %132, %141 : vector<8x256xf32>
    %c0_37 = arith.constant 0 : index
    %c0_38 = arith.constant 0 : index
    %c0_39 = arith.constant 0 : index
    %143 = vector.load %arg7[%c0_37, %c0_38, %c0_39] : memref<1x8x256xf32, #tpu.memory_space<vmem>>, vector<1x8x256xf32>
    %144 = vector.shape_cast %143 : vector<1x8x256xf32> to vector<8x256xf32>
    %145 = vector.shape_cast %142 : vector<8x256xf32> to vector<1x8x256xf32>
    tpu.vector_store %arg7[%c0_37, %c0_38, %c0_39], %145 {strides = array<i32>} : memref<1x8x256xf32, #tpu.memory_space<vmem>>, vector<1x8x256xf32>,
    return
  }
  func.func @transform_0(%arg0: i32) -> (i32, i32, i32) {
    %c0_i32 = arith.constant 0 : i32
    %c0_i32_0 = arith.constant 0 : i32
    %c0_i32_1 = arith.constant 0 : i32
    return %arg0, %c0_i32, %c0_i32_0 : i32, i32, i32
  }
  func.func @transform_1(%arg0: i32) -> (i32, i32) {
    %c0_i32 = arith.constant 0 : i32
    %c0_i32_0 = arith.constant 0 : i32
    %c0_i32_1 = arith.constant 0 : i32
    return %c0_i32, %c0_i32_0 : i32, i32
  }
  func.func @transform_2(%arg0: i32) -> (i32, i32) {
    %c0_i32 = arith.constant 0 : i32
    %c0_i32_0 = arith.constant 0 : i32
    %c0_i32_1 = arith.constant 0 : i32
    return %c0_i32, %c0_i32_0 : i32, i32
  }
  func.func @transform_3(%arg0: i32) -> (i32, i32) {
    %c0_i32 = arith.constant 0 : i32
    %c0_i32_0 = arith.constant 0 : i32
    %c0_i32_1 = arith.constant 0 : i32
    return %c0_i32, %c0_i32_0 : i32, i32
  }
  func.func @transform_4(%arg0: i32) -> (i32, i32) {
    %c0_i32 = arith.constant 0 : i32
    %c0_i32_0 = arith.constant 0 : i32
    %c0_i32_1 = arith.constant 0 : i32
    return %c0_i32, %c0_i32_0 : i32, i32
  }
  func.func @transform_5(%arg0: i32) -> (i32, i32) {
    %c0_i32 = arith.constant 0 : i32
    %c0_i32_0 = arith.constant 0 : i32
    %c0_i32_1 = arith.constant 0 : i32
    return %c0_i32, %c0_i32_0 : i32, i32
  }
  func.func @transform_6(%arg0: i32) -> (i32, i32, i32) {
    %c0_i32 = arith.constant 0 : i32
    %c0_i32_0 = arith.constant 0 : i32
    %c0_i32_1 = arith.constant 0 : i32
    return %arg0, %c0_i32, %c0_i32_0 : i32, i32, i32
  }
}

</mosaic_0001>

<bundles_post_ra>
// kernel: tpu_custom_call.1
= control target key start
LH: loop header
LB: loop body
LE: loop exit
PB: predicated region body
PF: predicated region fallthrough
CT: control target
= control target key end

     0   :  { %11 = vsyncpa [#allocation3], 0  ;;  %s1567_s0 = inlined_call_operand.vmem [shape: f32[2,4,256], index: 0, kind: input, shape index: {}]   ;;  %s1568_s1 = inlined_call_operand.hbm [shape: f32[8,36], index: 1, kind: input, shape index: {}]   ;;  %s1569_s2 = inlined_call_operand.vmem [shape: f32[8,1], index: 2, kind: input, shape index: {}]   ;;  %s1570_s3 = inlined_call_operand.hbm [shape: f32[8,72], index: 3, kind: input, shape index: {}]   ;;  %s1571_s4 = inlined_call_operand.vmem [shape: f32[8,1], index: 4, kind: input, shape index: {}]   ;;  %s1572_s5 = inlined_call_operand.hbm [shape: f32[9,256], index: 5, kind: input, shape index: {}]   ;;  %s1573_s6 = inlined_call_operand.hbm [shape: f32[2,8,256], index: 6, kind: output, shape index: {}]  }
   0x1   :  { %12 = vsyncpa [#allocation6], 0 }
   0x2   :  { %13 = vsyncpa [#allocation4], 0 }
   0x3   :  { %15 = vsyncpa [#allocation4 + $0x1], 0  ;;  %s1229_s21 = smov 0   ;;  %s1231_s22 = smov 0  }
   0x4   :  { %s1233_s23 = smov 0   ;;  %s1235_s24 = smov 0  }
   0x5 LB: > { %s1250_s25 = sadd.s32 4294967295, %s1176_s24   ;;  %s912_s26 = sadd.s32 4294967294, %s1176_s24   ;;  %s1176_s24 = sphi %s1235_s24, %s1591_s24   ;;  %s1172_s23 = sphi %s1233_s23, %s1590_s23   ;;  %s1168_s22 = sphi %s1231_s22, %s1589_s22   ;;  %s1164_s21 = sphi %s1229_s21, %s1588_s21  }
   0x6   : > { %s1254_s27 = sadd.s32 1, %s1176_s24   ;;  %s159_s28 = sadd.s32 1, %s1172_s23 }
   0x7   : > { %s156_s29 = ssub.s32 %s1176_s24, %s1254_s27  ;;  %p169_p0 = scmp.ne.s32.totalorder %s1172_s23, %s1168_s22 }
   0x8   : > { %p157_p1 = scmp.eq.s32.totalorder %s156_s29, 0  ;;  %p170_p2 = scmp.eq.s32.totalorder %s1250_s25, 1 }
   0x9   : > { %p175_p3 = scmp.ne.s32.totalorder %s1168_s22, %s1164_s21  ;;  %p176_p4 = scmp.eq.s32.totalorder %s912_s26, 1 }
   0xa   : > { %s1265_s30 = scalar_select %p157_p1, %s1172_s23, %s159_s28  }
   0xb   : > { %p1267_p5 = por %p170_p2, %p169_p0  ;;  %p1271_p6 = por %p176_p4, %p175_p3 }
   0xc   : > { %p913_p7 = scmp.ge.s32.totalorder %s1176_s24, 1  ;;  %p183_p8 = scmp.lt.s32.totalorder %s1176_s24, 3 }
   0xd   : > { %s1577_s7 = scalar_select %p1267_p5, 1, 0 }
   0xe   : > { %s1578_s8 = scalar_select %p1271_p6, 1, 0 }
   0xf   : > { %p1574_p9 = scmp.eq.s32.totalorder %s1250_s25, 0  ;;  %p1278_p10 = pnand %p913_p7, %p183_p8 }
  0x10   : > { %s1178_s10 = smov [#allocation5]   ;;  %s1179_s12 = smov [#allocation2]  }
  0x11   : > { %s1579_s9 = scalar_select %p1278_p10, 1, 0 }
  0x12   : > { %s210_s11 = sshll.u32 %s1178_s10, 4  ;;  %p952_p11 = pneg %p1278_p10  ;;  %s211_s11 = int_to_ptr.vmem [resolvable:$true] %s210_s11 }
  0x13   : > { %s196_s13 = sshll.u32 %s1179_s12, 4  ;;  %s1180_s15 = smov [#allocation7]   ;;  %s197_s13 = int_to_ptr.vmem [resolvable:$true] %s196_s13 }
  0x14   : > { %p1286_p12 = pnand %p1574_p9, %p952_p11  ;;  %s223_s16 = sshll.u32 %s1180_s15, 4  ;;  %s1290_s16 = int_to_ptr.vmem [resolvable:$true] %s223_s16 }
  0x15   : > { %s1041_s17 = scalar_lea.vmem %s211_s11, 128  ;;  %p1049_p3 = scmp.lt.s32.totalorder %s211_s11, %s211_s11 }
  0x16   : > { %p1032_p13 = pneg %p1286_p12  ;;  %p1042_p0 = scmp.ne.s32.totalorder %s211_s11, %s1041_s17 }
  0x17   : > { %p1050_p4 = scmp.lt.s32.totalorder %s1041_s17, %s1041_s17 }
  0x18   : > { %p1044_p1 = pnand %p1042_p0, %p1032_p13 }
  0x19   : > { %p1051_p7 = por %p1050_p4, %p1049_p3 }
  0x1a   : > { %p1045_p2 = pneg %p1044_p1 }
  0x1c   : > { %p1052_p8 = pnand %p1051_p7, %p1045_p2 }
  0x1e   : > { %1055 = shalt.err (!%p1052_p8)
}
  0x1f   : > { %958 = dma.hbm_to_vmem [thread:$0]  (!%p1286_p12), %s1570_s3, 128, %s211_s11, [#allocation6]  }
  0x20   : > { %s1067_s20 = scalar_lea.vmem %s197_s13, 128  ;;  %p1075_p0 = scmp.lt.s32.totalorder %s197_s13, %s197_s13 }
  0x21   : > { %p1068_p11 = scmp.ne.s32.totalorder %s197_s13, %s1067_s20  ;;  %p1076_p1 = scmp.lt.s32.totalorder %s1067_s20, %s1067_s20 }
  0x23   : > { %p1070_p9 = pnand %p1068_p11, %p1032_p13  ;;  %p1077_p5 = por %p1076_p1, %p1075_p0 }
  0x25   : > { %p1071_p6 = pneg %p1070_p9 }
  0x27   : > { %p1078_p10 = pnand %p1077_p5, %p1071_p6 }
  0x29   : > { %1081 = shalt.err (!%p1078_p10)
}
  0x2a   : > { %955 = dma.hbm_to_vmem [thread:$0]  (!%p1286_p12), %s1568_s1, 128, %s197_s13, [#allocation3]  }
  0x2b   : > { %s1093_s29 = scalar_lea.vmem %s1290_s16, 512  ;;  %p1101_p4 = scmp.lt.s32.totalorder %s1290_s16, %s1290_s16 }
  0x2c   : > { %p1094_p2 = scmp.ne.s32.totalorder %s1290_s16, %s1093_s29  ;;  %p1102_p5 = scmp.lt.s32.totalorder %s1093_s29, %s1093_s29 }
  0x2e   : > { %p1096_p9 = pnand %p1094_p2, %p1032_p13  ;;  %p1103_p6 = por %p1102_p5, %p1101_p4 }
  0x30   : > { %p1097_p3 = pneg %p1096_p9 }
  0x32   : > { %p1104_p10 = pnand %p1103_p6, %p1097_p3 }
  0x34   : > { %1107 = shalt.err (!%p1104_p10)
}
  0x35   : > { %s1181_s10 = smov 256   ;;  %s1182_s11 = smov 16  }
  0x36   : > { %961 = dma.hbm_to_vmem [thread:$0]  (!%p1286_p12), %s1572_s5, 512, %s1290_s16, [#allocation6], %s1181_s10, %s1181_s10, %s1182_s11  }
  0x37   : > { %p1581_p7 = scmp.ne.s32.totalorder %s1579_s9, 0 }
  0x38   : > { %p1582_p13 = scmp.eq.s32.totalorder (!%p1581_p7), %s1250_s25, 0 }
  0x39   : > { %247 = sbr.rel (%p1581_p7) target bundleno = 856 (0x358), region = 44 }
  0x3e   : > { %1151 = dma.done.wait (%p1582_p13), [#allocation3], 128   ;;  %p1583_p8 = pmov %p1582_p13 }
  0x40   : > { %1153 = vsyncadd (%p1583_p8), [#allocation3], 4294967168  ;;  %p1584_p11 = pmov %p1583_p8 }
  0x41   : > { %p1585_p0 = pmov %p1583_p8 }
  0x42   : > { %1155 = dma.done.wait (%p1584_p11), [#allocation6], 640  }
  0x43   : > { %1157 = vsyncadd (%p1585_p0), [#allocation6], 4294966656  ;;  %p285_p1 = scmp.lt.s32.totalorder %s1250_s25, 1  ;;  %s1183_s18 = smov 111   ;;  %v1189_v2 = vmov 0.0   ;;  %v1190_v3 = vmov 0   ;;  %v307_v5 = vlaneseq }
  0x44   : > { %s1184_s19 = smov 112   ;;  %s1185_s20 = smov 127   ;;  %579 = vmatprep.mubr.f32.mxu0 %v1189_v2  ;;  %772 = vmatprep.mubr.f32.mxu1 %v1189_v2  ;;  %v499_v4 = vld [vmem:[%s1569_s2] sm:$0xff]  ;;  %v1373_v9 = vld [vmem:[#allocation7 + $0x8] sm:$0xff]  ;;  %v1375_v12 = vld [vmem:[#allocation7] sm:$0xff]  ;;  %vm448_vm0 = vcmask 908288  }
  0x45   : > { %s286_s13 = scalar_select %p285_p1, %s1250_s25, 1  ;;  %1020 = vset.pattern.permute.xlu0 %v1190_v3  ;;  %v1369_v6 = vshrl.u32 %v307_v5, 7  ;;  %vm429_vm1 = vcmask 916480   ;;  %v1388_v18 = vld [vmem:[#allocation7 + $0x10] ss:$0 sm:$0xff]  ;;  %vm490_vm2 = vcmask 1043456  }
  0x46   : > { %s1186_s26 = smov 113   ;;  %s1187_s28 = smov 1   ;;  %v1390_v19 = vld [vmem:[#allocation7 + $0x18] ss:$0 sm:$0xff]  ;;  %vm391_vm3 = vcmask 1039360   ;;  %vm410_vm4 = vcmask 924672  }
  0x47   : > { %s936_s14 = sshll.u32 %s286_s13, 3  ;;  %s1188_s29 = smov 16   ;;  %v376_v7 = vsub.s32 4, %v1369_v6  ;;  %v436_v8 = vsub.s32 7, %v1369_v6  ;;  %v398_v13 = vsub.s32 5, %v1369_v6  ;;  %v417_v17 = vsub.s32 6, %v1369_v6 }
  0x48   : > { %s289_s17 = scalar_lea.vmem %s1567_s0, %s936_s14  ;;  %s1191_s10 = smov 15   ;;  %v366_v47 = vsub.s32 3, %v1369_v6  ;;  %vm359_vm5 = vcmask 7168   ;;  %v328_v62 = vsub.s32 1, %v1369_v6  ;;  %v347_v2 = vsub.s32 2, %v1369_v6 }
  0x49   : > { %v1338_v0 = vld [vmem:[%s289_s17] sm:$0xff]  ;;  %s1192_s11 = smov 17   ;;  %v1379_v14 = vrot.slane %v1375_v12, %v376_v7  ;;  %v1382_v15 = vrot.slane %v1373_v9, %v376_v7  ;;  %v1385_v16 = vrot.slane %v1373_v9, %v436_v8  ;;  %v1393_v21 = vrot.slane %v1375_v12, %v436_v8  ;;  %s282_s16 = sand.u32 1, %s1168_s22  }
  0x4a   : > { %444 = vrot.lane.b32.xlu1 %v1338_v0, %s1183_s18  ;;  %425 = vrot.lane.b32.xlu0 %v1338_v0, %s1184_s19  ;;  %v297_v1 = vcombine.high %v1338_v0, %v1338_v0  ;;  %v1396_v23 = vrot.slane %v1373_v9, %v398_v13  ;;  %v1407_v31 = vrot.slane %v1373_v9, %v417_v17  ;;  %vm321_vm6 = vcmask 130048   ;;  %s922_s9 = sshll.u32 %s282_s16, 4  ;;  %s937_s17 = sshll.u32 %s1250_s25, 8 }
  0x4b   : > { %v384_v27 = vcombine.low %v1379_v14, %v1382_v15  ;;  %v1412_v35 = vrot.slane %v1375_v12, %v417_v17  ;;  %v1418_v38 = vrot.slane %v1375_v12, %v398_v13  ;;  %v1432_v59 = vrot.slane %v1375_v12, %v366_v47  ;;  %p1586_p2 = scmp.ne.s32.totalorder %s1577_s7, 0 }
  0x4c   : > { %v1435_v60 = vrot.slane %v1373_v9, %v366_v47  ;;  %v309_v5 = vsub.s32 0, %v1369_v6  ;;  %vm340_vm7 = vcmask 121856   ;;  %v1453_v13 = vrot.slane %v1375_v12, %v347_v2 }
  0x4d   : > { %v386_v39 = vmul.f32 %v384_v27, %v1338_v0  ;;  %v1456_v17 = vrot.slane %v1373_v9, %v347_v2  ;;  %vm302_vm8 = vcmask 138240   ;;  %vm505_vm9 = vcmask 293888  }
  0x4e   : > { %446 = vrot.lane.b32.xlu1 %v297_v1, %s1183_s18  ;;  %427 = vrot.lane.b32.xlu0 %v297_v1, %s1184_s19  ;;  %vm704_vm10 = vcmask 588800  }
  0x4f   : > { %v476_v51 = vcombine.high %v386_v39, %v386_v39 }
  0x52   : > { %389 = vrot.lane.b32.xlu1 %v297_v1, %s1185_s20  ;;  %408 = vrot.lane.b32.xlu0 %v297_v1, %s1186_s26 }
  0x56   : > { %406 = vrot.lane.b32.xlu1 %v1338_v0, %s1186_s26  ;;  %387 = vrot.lane.b32.xlu0 %v1338_v0, %s1185_s20 }
  0x5a   : > { %357 = vrot.lane.b32.xlu1 %v297_v1, %s1187_s28  ;;  %355 = vrot.lane.b32.xlu0 %v1338_v0, %s1187_s28 }
  0x5e   : > { %319 = vrot.lane.b32.xlu1 %v297_v1, %s1188_s29  ;;  %317 = vrot.lane.b32.xlu0 %v1338_v0, %s1188_s29 }
  0x62   : > { %338 = vrot.lane.b32.xlu1 %v297_v1, %s1191_s10  ;;  %336 = vrot.lane.b32.xlu0 %v1338_v0, %s1191_s10 }
  0x66   : > { %300 = vrot.lane.b32.xlu1 %v297_v1, %s1192_s11  ;;  %298 = vrot.lane.b32.xlu0 %v1338_v0, %s1192_s11 }
  0x6a   : > { %502 = vperm.xlu0 %1020, %v499_v4  }
  0xbc   : > { %v445_v10 = vpop.permute.xlu1 %444  ;;  %v426_v11 = vpop.permute.xlu0 %425 }
  0xc0   : > { %v447_v20 = vpop.permute.xlu1 %446  ;;  %v428_v22 = vpop.permute.xlu0 %427 }
  0xc1   : > { %v449_v24 = vsel %vm448_vm0, %v445_v10, %v447_v20  ;;  %v452_v25 = vsel %vm448_vm0, %v447_v20, 0.0  ;;  %v433_v26 = vsel %vm429_vm1, %v428_v22, 0.0  ;;  %v430_v32 = vsel %vm429_vm1, %v426_v11, %v428_v22 }
  0xc2   : > { %v461_v28 = vmul.f32 %v1388_v18, %v449_v24  ;;  %v443_v29 = vmul.f32 %v1385_v16, %v433_v26  ;;  %v462_v30 = vmul.f32 %v1390_v19, %v452_v25  ;;  %v442_v40 = vmul.f32 %v1393_v21, %v430_v32 }
  0xc3   : > { %v1447_v10 = vrot.slane %v1375_v12, %v328_v62  ;;  %v1450_v11 = vrot.slane %v1373_v9, %v328_v62  ;;  %v1461_v25 = vrot.slane %v1375_v12, %v309_v5  ;;  %v1464_v26 = vrot.slane %v1373_v9, %v309_v5 }
  0xc4   : > { %927 = vmatprep.subr.msk.mxu0 %vm490_vm2, %v462_v30  ;;  %v390_v33 = vpop.permute.xlu1 %389  ;;  %v409_v34 = vpop.permute.xlu0 %408  ;;  %v487_v41 = vrot.slane %v443_v29, 4  ;;  %v486_v52 = vrot.slane %v442_v40, 4 }
  0xc5   : > { %v395_v36 = vsel %vm391_vm3, %v390_v33, 0.0  ;;  %v414_v37 = vsel %vm410_vm4, %v409_v34, 0.0  ;;  %928 = vmatpush1.msk.msra.mxu0 %vm490_vm2, %v461_v28 }
  0xc6   : > { %v405_v42 = vmul.f32 %v1396_v23, %v395_v36  ;;  %v424_v43 = vmul.f32 %v1407_v31, %v414_v37 }
  0xc8   : > { %v407_v44 = vpop.permute.xlu1 %406  ;;  %v388_v45 = vpop.permute.xlu0 %387  ;;  %v498_v46 = vsel %vm490_vm2, %v424_v43, %v487_v41  ;;  %v481_v48 = vrot.slane %v405_v42, 4 }
  0xc9   : > { %v411_v49 = vsel %vm410_vm4, %v407_v44, %v409_v34  ;;  %v392_v50 = vsel %vm391_vm3, %v388_v45, %v390_v33  ;;  %539 = vmatprep.subr.mxu0 %v498_v46 }
  0xca   : > { %v423_v53 = vmul.f32 %v1412_v35, %v411_v49  ;;  %v404_v54 = vmul.f32 %v1418_v38, %v392_v50  ;;  %v496_v61 = vsel %vm490_vm2, %v476_v51, %v481_v48  ;;  %v295_v48 = vld [vmem:[#allocation2] sm:$0xff] }
  0xcc   : > { %v480_v55 = vrot.slane %v404_v54, 4  ;;  %v358_v56 = vpop.permute.xlu1 %357  ;;  %v356_v57 = vpop.permute.xlu0 %355  ;;  %v497_v58 = vsel %vm490_vm2, %v423_v53, %v486_v52 }
  0xcd   : > { %540 = vmatpush1.msra.mxu0 %v497_v58  ;;  %v360_v63 = vsel %vm359_vm5, %v356_v57, %v358_v56  ;;  %v363_v0 = vsel %vm359_vm5, 0.0, %v356_v57 }
  0xce   : > { %541 = vmatprep.subr.mxu0 %v496_v61  ;;  %v495_v1 = vsel %vm490_vm2, %v386_v39, %v480_v55  ;;  %v372_v7 = vmul.f32 %v1432_v59, %v363_v0  ;;  %v373_v8 = vmul.f32 %v1435_v60, %v360_v63 }
  0xcf   : > { %542 = vmatpush1.msra.mxu0 %v495_v1 }
  0xd0   : > { %v320_v3 = vpop.permute.xlu1 %319  ;;  %v318_v4 = vpop.permute.xlu0 %317  ;;  %v471_v27 = vrot.slane %v372_v7, 4  ;;  %v472_v28 = vrot.slane %v373_v8, 4 }
  0xd1   : > { %v322_v20 = vsel %vm321_vm6, %v318_v4, %v320_v3  ;;  %v325_v6 = vsel %vm321_vm6, 0.0, %v318_v4 }
  0xd2   : > { %v334_v32 = vmul.f32 %v1447_v10, %v325_v6  ;;  %v335_v33 = vmul.f32 %v1450_v11, %v322_v20 }
  0xd4   : > { %v339_v22 = vpop.permute.xlu1 %338  ;;  %v337_v24 = vpop.permute.xlu0 %336  ;;  %v465_v42 = vrot.slane %v334_v32, 4  ;;  %v466_v43 = vrot.slane %v335_v33, 4 }
  0xd5   : > { %v341_v29 = vsel %vm340_vm7, %v337_v24, %v339_v22  ;;  %v344_v30 = vsel %vm340_vm7, 0.0, %v337_v24 }
  0xd6   : > { %v353_v34 = vmul.f32 %v1453_v13, %v344_v30  ;;  %v354_v36 = vmul.f32 %v1456_v17, %v341_v29 }
  0xd8   : > { %v301_v37 = vpop.permute.xlu1 %300  ;;  %v299_v12 = vpop.permute.xlu0 %298  ;;  %v494_v39 = vsel %vm490_vm2, %v354_v36, %v472_v28  ;;  %v493_v9 = vsel %vm490_vm2, %v353_v34, %v471_v27  ;;  %v698_v34 = vld [vmem:[%s1571_s4] sm:$0xff] }
  0xd9   : > { %v303_v40 = vsel %vm302_vm8, %v299_v12, %v301_v37  ;;  %v306_v41 = vsel %vm302_vm8, 0.0, %v299_v12  ;;  %543 = vmatprep.subr.mxu0 %v494_v39 }
  0xda   : > { %v315_v44 = vmul.f32 %v1461_v25, %v306_v41  ;;  %v316_v45 = vmul.f32 %v1464_v26, %v303_v40  ;;  %544 = vmatpush1.msra.mxu0 %v493_v9 }
  0xdc   : > { %v492_v46 = vsel %vm490_vm2, %v316_v45, %v466_v43  ;;  %v491_v47 = vsel %vm490_vm2, %v315_v44, %v465_v42 }
  0xdd   : > { %545 = vmatprep.subr.mxu0 %v492_v46 }
  0xde   : > { %546 = vmatpush1.msra.mxu0 %v491_v47 }
  0xdf   : > { %929 = vmatmul.mubr.msk.f32.vlgmr.msra.gmra.mxu0 %vm505_vm9, %v295_v48 }
  0xe5   : > { %v503_v49 = vpop.permute.xlu0 %502 }
 0x19f   : > { %v581_v50 = vpop.f32.mrf.mxu0 }
 0x1a0   : > { %v582_v51 = vadd.f32 %v581_v50, %v503_v49 }
 0x1a1   : > { %v583_v52 = vpop.f32.mrf.mxu0 }
 0x1a2   : > { %v586_v53 = vmul.f32 0.2, %v582_v51  ;;  %v584_v54 = vadd.f32 %v583_v52, %v503_v49 }
 0x1a4   : > { %v588_v55 = vmax.f32 %v582_v51, %v586_v53  ;;  %v587_v56 = vmul.f32 0.2, %v584_v54 }
 0x1a6   : > { %v590_v57 = vmul.f32 %v588_v55, %v588_v55  ;;  %v589_v58 = vmax.f32 %v584_v54, %v587_v56 }
 0x1a8   : > { %v592_v61 = vrot.slane %v590_v57, 4  ;;  %v591_v62 = vmul.f32 %v589_v58, %v589_v58 }
 0x1aa   : > { %v593_v63 = vadd.f32 %v592_v61, %v590_v57  ;;  %v598_v0 = vrot.slane %v591_v62, 4 }
 0x1ac   : > { %v594_v1 = vrot.slane %v593_v63, 2  ;;  %v599_v2 = vadd.f32 %v598_v0, %v591_v62 }
 0x1ae   : > { %v595_v3 = vadd.f32 %v594_v1, %v593_v63  ;;  %v600_v4 = vrot.slane %v599_v2, 2 }
 0x1b0   : > { %v596_v5 = vrot.slane %v595_v3, 1  ;;  %v601_v7 = vadd.f32 %v600_v4, %v599_v2 }
 0x1b2   : > { %v597_v8 = vadd.f32 %v596_v5, %v595_v3  ;;  %v602_v20 = vrot.slane %v601_v7, 1 }
 0x1b4   : > { %v605_v6 = vmul.f32 0.125, %v597_v8  ;;  %v603_v22 = vadd.f32 %v602_v20, %v601_v7 }
 0x1b6   : > { %v607_v24 = vadd.f32 1e-08, %v605_v6  ;;  %v606_v27 = vmul.f32 0.125, %v603_v22  ;;  %v613_v22 = vld [vmem:[#allocation5] sm:$0xff] }
 0x1b8   : > { %1022 = vrsqrt.f32 %v607_v24  ;;  %v608_v28 = vadd.f32 1e-08, %v606_v27 }
 0x1ba   : > { %1024 = vrsqrt.f32 %v608_v28 }
 0x1c5   : > { %v1023_v29 = vpop.eup %1022 }
 0x1c6   : > { %v611_v30 = vmul.f32 %v1023_v29, %v588_v55 }
 0x1c7   : > { %v1025_v32 = vpop.eup %1024 }
 0x1c8   : > { %646 = vrot.lane.b32.xlu0 %v611_v30, %s1187_s28  ;;  %688 = vrot.lane.b32.xlu1 %v611_v30, %s1183_s18  ;;  %v612_v33 = vmul.f32 %v1025_v32, %v589_v58 }
 0x1cc   : > { %680 = vrot.lane.b32.xlu0 %v612_v33, %s1184_s19  ;;  %678 = vrot.lane.b32.xlu1 %v611_v30, %s1184_s19 }
 0x1d0   : > { %670 = vrot.lane.b32.xlu0 %v612_v33, %s1186_s26  ;;  %668 = vrot.lane.b32.xlu1 %v611_v30, %s1186_s26 }
 0x1d4   : > { %660 = vrot.lane.b32.xlu0 %v612_v33, %s1185_s20  ;;  %658 = vrot.lane.b32.xlu1 %v611_v30, %s1185_s20 }
 0x1d8   : > { %636 = vrot.lane.b32.xlu0 %v611_v30, %s1191_s10  ;;  %690 = vrot.lane.b32.xlu1 %v612_v33, %s1183_s18  ;;  %s284_s18 = scalar_lea.vmem [#allocation8], %s922_s9 }
 0x1d9   : > { %s822_s19 = sshll.u32 %s284_s18, 4  ;;  %s823_s19 = int_to_ptr.vmem [resolvable:$true] %s822_s19 }
 0x1dc   : > { %626 = vrot.lane.b32.xlu0 %v611_v30, %s1188_s29  ;;  %648 = vrot.lane.b32.xlu1 %v612_v33, %s1187_s28  ;;  %s820_s28 = scalar_lea.hbm %s1573_s6, %s937_s17 }
 0x1e0   : > { %616 = vrot.lane.b32.xlu0 %v611_v30, %s1192_s11  ;;  %638 = vrot.lane.b32.xlu1 %v612_v33, %s1191_s10  ;;  %s1108_s10 = scalar_lea.vmem %s823_s19, 256 }
 0x1e1   : > { %p1109_p12 = scmp.ne.s32.totalorder %s823_s19, %s1108_s10 }
 0x1e3   : > { %p1110_p9 = pnand %p1109_p12, %p1586_p2 }
 0x1e4   : > { %701 = vperm.xlu0 %1020, %v698_v34   ;;  %628 = vrot.lane.b32.xlu1 %v612_v33, %s1188_s29  ;;  %s808_s29 = scalar_lea.sflag [#allocation4], %s282_s16 }
 0x1e5   : > { %p1111_p3 = pneg %p1110_p9 }
 0x1e8   : > { %618 = vrot.lane.b32.xlu1 %v612_v33, %s1192_s11  ;;  %s1193_s11 = smov [#allocation8]  }
 0x1e9   : > { %s1112_s25 = sshll.u32 %s1193_s11, 4  ;;  %s1113_s25 = int_to_ptr.vmem [resolvable:$false] %s1112_s25 }
 0x1ea   : > { %s1114_s12 = scalar_lea.vmem %s1113_s25, 512  ;;  %p1115_p4 = scmp.lt.s32.totalorder %s823_s19, %s1113_s25 }
 0x1eb   : > { %p1116_p5 = scmp.lt.s32.totalorder %s1114_s12, %s1108_s10 }
 0x1ed   : > { %p1117_p6 = por %p1116_p5, %p1115_p4 }
 0x1ef   : > { %p1118_p10 = pnand %p1117_p6, %p1111_p3 }
 0x23a   : > { %v647_v36 = vpop.permute.xlu0 %646  ;;  %v689_v37 = vpop.permute.xlu1 %688 }
 0x23b   : > { %v653_v63 = vsel %vm359_vm5, 0.0, %v647_v36 }
 0x23e   : > { %v681_v12 = vpop.permute.xlu0 %680  ;;  %v679_v39 = vpop.permute.xlu1 %678 }
 0x23f   : > { %v685_v44 = vsel %vm429_vm1, %v681_v12, 0.0  ;;  %v682_v48 = vsel %vm429_vm1, %v679_v39, %v681_v12 }
 0x240   : > { %v687_v52 = vmul.f32 %v685_v44, %v1385_v16  ;;  %v686_v55 = vmul.f32 %v682_v48, %v1393_v21 }
 0x242   : > { %v671_v9 = vpop.permute.xlu0 %670  ;;  %v669_v40 = vpop.permute.xlu1 %668 }
 0x243   : > { %v675_v51 = vsel %vm410_vm4, %v671_v9, 0.0  ;;  %v672_v53 = vsel %vm410_vm4, %v669_v40, %v671_v9 }
 0x244   : > { %v677_v57 = vmul.f32 %v675_v51, %v1407_v31  ;;  %v657_v31 = vmul.f32 %v612_v33, %v1382_v15 }
 0x246   : > { %v661_v41 = vpop.permute.xlu0 %660  ;;  %v659_v42 = vpop.permute.xlu1 %658 }
 0x247   : > { %v665_v56 = vsel %vm391_vm3, %v661_v41, 0.0  ;;  %v662_v58 = vsel %vm391_vm3, %v659_v42, %v661_v41 }
 0x248   : > { %v667_v16 = vmul.f32 %v665_v56, %v1396_v23  ;;  %v666_v62 = vmul.f32 %v662_v58, %v1418_v38  ;;  %v654_v38 = vmul.f32 %v653_v63, %v1432_v59 }
 0x24a   : > { %v691_v43 = vpop.permute.xlu1 %690  ;;  %v637_v45 = vpop.permute.xlu0 %636 }
 0x24b   : > { %v692_v46 = vsel %vm448_vm0, %v689_v37, %v691_v43  ;;  %v695_v47 = vsel %vm448_vm0, %v691_v43, 0.0  ;;  %v643_v1 = vsel %vm340_vm7, 0.0, %v637_v45 }
 0x24c   : > { %v697_v49 = vmul.f32 %v1390_v19, %v695_v47  ;;  %v696_v50 = vmul.f32 %v1388_v18, %v692_v46  ;;  %v676_v18 = vmul.f32 %v672_v53, %v1412_v35  ;;  %v656_v35 = vmul.f32 %v611_v30, %v1379_v14 }
 0x24d   : > { %v644_v7 = vmul.f32 %v643_v1, %v1453_v13 }
 0x24e   : > { %722 = vmatprep.subr.mxu1 %v697_v49  ;;  %v649_v54 = vpop.permute.xlu1 %648  ;;  %v627_v19 = vpop.permute.xlu0 %626 }
 0x24f   : > { %723 = vmatpush1.msra.mxu1 %v696_v50  ;;  %v650_v21 = vsel %vm359_vm5, %v647_v36, %v649_v54  ;;  %v633_v5 = vsel %vm321_vm6, 0.0, %v627_v19 }
 0x250   : > { %724 = vmatprep.subr.mxu1 %v687_v52  ;;  %v655_v23 = vmul.f32 %v650_v21, %v1435_v60  ;;  %v634_v59 = vmul.f32 %v633_v5, %v1447_v10 }
 0x251   : > { %725 = vmatpush1.msra.mxu1 %v686_v55 }
 0x252   : > { %726 = vmatprep.subr.mxu1 %v677_v57  ;;  %v639_v61 = vpop.permute.xlu1 %638  ;;  %v617_v3 = vpop.permute.xlu0 %616 }
 0x253   : > { %727 = vmatpush1.msra.mxu1 %v676_v18  ;;  %v640_v0 = vsel %vm340_vm7, %v637_v45, %v639_v61  ;;  %v623_v14 = vsel %vm302_vm8, 0.0, %v617_v3 }
 0x254   : > { %728 = vmatprep.subr.mxu1 %v667_v16  ;;  %v645_v15 = vmul.f32 %v640_v0, %v1456_v17  ;;  %v624_v17 = vmul.f32 %v623_v14, %v1461_v25 }
 0x255   : > { %729 = vmatpush1.msra.mxu1 %v666_v62 }
 0x256   : > { %730 = vmatprep.subr.mxu1 %v657_v31  ;;  %v629_v2 = vpop.permute.xlu1 %628 }
 0x257   : > { %v630_v4 = vsel %vm321_vm6, %v627_v19, %v629_v2  ;;  %731 = vmatpush1.msra.mxu1 %v656_v35 }
 0x258   : > { %732 = vmatprep.subr.mxu1 %v655_v23  ;;  %v635_v60 = vmul.f32 %v630_v4, %v1450_v11 }
 0x259   : > { %733 = vmatpush1.msra.mxu1 %v654_v38 }
 0x25a   : > { %v619_v8 = vpop.permute.xlu1 %618  ;;  %734 = vmatprep.subr.mxu1 %v645_v15 }
 0x25b   : > { %v620_v20 = vsel %vm302_vm8, %v617_v3, %v619_v8  ;;  %735 = vmatpush1.msra.mxu1 %v644_v7 }
 0x25c   : > { %v625_v6 = vmul.f32 %v620_v20, %v1464_v26  ;;  %736 = vmatprep.subr.mxu1 %v635_v60 }
 0x25d   : > { %737 = vmatpush1.msra.mxu1 %v634_v59 }
 0x25e   : > { %738 = vmatprep.subr.mxu1 %v625_v6 }
 0x25f   : > { %739 = vmatpush1.msra.mxu1 %v624_v17  ;;  %v702_v13 = vpop.permute.xlu0 %701 }
 0x260   : > { %930 = vmatmul.mubr.msk.f32.vlgmr.msra.gmra.mxu1 %vm704_vm10, %v613_v22 }
 0x320   : > { %v774_v11 = vpop.f32.mrf.mxu1 }
 0x321   : > { %v775_v24 = vadd.f32 %v774_v11, %v702_v13 }
 0x322   : > { %v776_v27 = vpop.f32.mrf.mxu1 }
 0x323   : > { %v779_v28 = vmul.f32 0.2, %v775_v24  ;;  %v777_v10 = vadd.f32 %v776_v27, %v702_v13 }
 0x325   : > { %v781_v29 = vmax.f32 %v775_v24, %v779_v28  ;;  %v780_v30 = vmul.f32 0.2, %v777_v10 }
 0x327   : > { %v783_v32 = vmul.f32 %v781_v29, %v781_v29  ;;  %v782_v33 = vmax.f32 %v777_v10, %v780_v30 }
 0x329   : > { %v785_v26 = vrot.slane %v783_v32, 4  ;;  %v784_v34 = vmul.f32 %v782_v33, %v782_v33 }
 0x32b   : > { %v786_v36 = vadd.f32 %v785_v26, %v783_v32  ;;  %v791_v25 = vrot.slane %v784_v34, 4 }
 0x32d   : > { %v787_v37 = vrot.slane %v786_v36, 2  ;;  %v792_v12 = vadd.f32 %v791_v25, %v784_v34 }
 0x32f   : > { %v788_v39 = vadd.f32 %v787_v37, %v786_v36  ;;  %v793_v9 = vrot.slane %v792_v12, 2 }
 0x331   : > { %v789_v40 = vrot.slane %v788_v39, 1  ;;  %v794_v41 = vadd.f32 %v793_v9, %v792_v12 }
 0x333   : > { %v790_v42 = vadd.f32 %v789_v40, %v788_v39  ;;  %v795_v43 = vrot.slane %v794_v41, 1 }
 0x335   : > { %v797_v44 = vmul.f32 0.125, %v790_v42  ;;  %v796_v45 = vadd.f32 %v795_v43, %v794_v41 }
 0x337   : > { %v799_v46 = vadd.f32 1e-08, %v797_v44  ;;  %v798_v47 = vmul.f32 0.125, %v796_v45 }
 0x339   : > { %1026 = vrsqrt.f32 %v799_v46  ;;  %v800_v48 = vadd.f32 1e-08, %v798_v47 }
 0x33b   : > { %1028 = vrsqrt.f32 %v800_v48 }
 0x346   : > { %v1027_v49 = vpop.eup %1026 }
 0x347   : > { %v803_v50 = vmul.f32 %v1027_v49, %v781_v29 }
 0x348   : > { %v1029_v51 = vpop.eup %1028 }
 0x349   : > { %v804_v52 = vmul.f32 %v1029_v51, %v782_v33  ;;  %805 = vst [vmem:[%s284_s18] sm:$0xff] %v803_v50 }
 0x34b   : > { %806 = vst [vmem:[%s284_s18 + $0x8] sm:$0xff] %v804_v52 }
 0x34c   : > { %1121 = shalt.err (!%p1118_p10)
}
 0x34d   : > { %s1122_s15 = scalar_lea.hbm %s820_s28, 256  ;;  %s1126_s16 = scalar_lea.hbm %s1573_s6, 512 }
 0x34e   : > { %p1123_p7 = scmp.ne.s32.totalorder %s820_s28, %s1122_s15  ;;  %p1127_p11 = scmp.lt.s32.totalorder %s820_s28, %s1573_s6 }
 0x34f   : > { %p1128_p0 = scmp.lt.s32.totalorder %s1126_s16, %s1122_s15 }
 0x350   : > { %p1124_p13 = pnand %p1123_p7, %p1586_p2 }
 0x351   : > { %p1129_p1 = por %p1128_p0, %p1127_p11 }
 0x352   : > { %p1125_p8 = pneg %p1124_p13 }
 0x354   : > { %p1130_p12 = pnand %p1129_p1, %p1125_p8 }
 0x356   : > { %1133 = shalt.err (!%p1130_p12)
}
 0x357   : > { %950 = dma.vmem_to_hbm [thread:$0]  (%p1586_p2), %s823_s19, 256, %s820_s28, %s808_s29  }
 0x358 PF: > { %p972_p9 = scmp.ge.s32.totalorder %s1176_s24, 2  ;;  %s834_s18 = sand.u32 1, %s1164_s21  }
 0x359   : > { %p1587_p3 = scmp.ne.s32.totalorder %s1578_s8, 0  ;;  %s835_s20 = scalar_lea.sflag [#allocation4], %s834_s18 }
 0x35b   : > { %p963_p4 = pnand %p972_p9, %p1587_p3 }
 0x35d   : > { %p964_p5 = pneg %p963_p4 }
 0x35f   : > { %1159 = dma.done.wait (%p964_p5), %s835_s20, 256  }
 0x360   : > { %1161 = vsyncadd (%p964_p5), %s835_s20, 4294967040  ;;  %p18_p6 = scmp.ge.s32.totalorder %s1254_s27, 4   ;;  %s1588_s21 = smov %s1168_s22 }
 0x361   : > { %s1589_s22 = smov %s1172_s23  ;;  %s1590_s23 = smov %s1265_s30 }
 0x362   : > { %s1591_s24 = smov %s1254_s27  ;;  %20 = sbr.rel (!%p18_p6) target bundleno = 5 (0x5), region = 92 }
 0x367   :  { %840 = vsyncpa [#allocation3], 1 }
 0x368   :  { %842 = vsyncpa [#allocation3 + $0x1], 1 }
 0x369   :  { %843 = vsyncpa [#allocation6], 1 }
 0x36a   :  { %844 = vsyncpa [#allocation4], 1 }
 0x36b   :  { %846 = vsyncpa [#allocation4 + $0x1], 1 }

</bundles_post_ra>
